<compile_context>
chip_gen: v7x
topology: tpu7x:2x2x1
jax: 0.10.0
libtpu: 0.0.40
codegen_flags: <defaults>
</compile_context>

<pallas_src>
import functools

import jax
import jax.numpy as jnp
from jax.experimental import pallas as pl
from jax.experimental.pallas import tpu as pltpu


def _round_up(x, m):
    return (x + m - 1) // m * m


def gcn_kernel(adj_ref, xw_ref, b_ref, out_ref, acc_ref):
    k = pl.program_id(1)

    @pl.when(k == 0)
    def _():
        acc_ref[...] = jnp.zeros_like(acc_ref)

    acc_ref[...] += jnp.dot(adj_ref[...], xw_ref[...],
                            preferred_element_type=jnp.float32)

    @pl.when(k == pl.num_programs(1) - 1)
    def _():
        out_ref[...] = (acc_ref[...] + b_ref[...]).astype(out_ref.dtype)


def _edge_norm_values(edge_index, N):
    """degree / sqrt-norm / nan_to_num, matching the torch reference exactly."""
    row, col = edge_index[0], edge_index[1]
    deg = jnp.zeros((N,), jnp.float32).at[col].add(1.0)            # degree(col, N)
    d_norm_in = jnp.sqrt(1.0 / deg[col])
    d_norm_out = jnp.sqrt(1.0 / deg[row])
    value = jnp.ones_like(row, dtype=jnp.float32) * d_norm_in * d_norm_out
    return jnp.nan_to_num(value, nan=0.0, posinf=0.0, neginf=0.0), row, col


def _normalized_dense_adj(edge_index, N, n_rows=None, n_cols=None):
    """Densified SparseTensor(row=col, col=row, value), built at padded shape.

    Entries land at (col[e], row[e]) so (adj @ x)[i] sums over in-edges of i.
    """
    # TODO(synk): replace this O(N^2) densification with a true sparse SpMM
    # (scalar-prefetch tile skipping or pl.ANY + make_async_copy CSR gather).
    n_rows = N if n_rows is None else n_rows
    n_cols = N if n_cols is None else n_cols
    value, row, col = _edge_norm_values(edge_index, N)
    return jnp.zeros((n_rows, n_cols), jnp.float32).at[col, row].add(value)


@functools.partial(jax.jit, static_argnames=("tm", "tk"))
def graph_conv_forward(x, edge_index, x0, W, bias, *, tm=1024, tk=1024):
    # use_init=False path (constructor default): x0 is unused.
    # TODO(synk): use_init=True path (concat [agg, x0] before the Linear) not wired up.
    del x0
    N, c_in = x.shape
    c_out = W.shape[0]

    # Tile sizes (clamped for small graphs), keeping (8, 128) alignment.
    tm = min(tm, _round_up(N, 8))
    tk = min(tk, _round_up(N, 128))
    c_pad = _round_up(c_out, 128)            # lane-dense output stores
    n_rows = _round_up(N, tm)
    n_cols = _round_up(N, tk)
    grid = (n_rows // tm, n_cols // tk)

    # Normalized adjacency, scattered straight into the padded buffer (no
    # second O(N^2) pad copy), then quantized to bf16 for the MXU.
    adj_p = _normalized_dense_adj(edge_index, N, n_rows, n_cols).astype(jnp.bfloat16)

    # Reassociation: (adj @ x) @ W^T + b  ==  adj @ (x @ W^T) + b.
    # Pad the *small* operands so xw comes out already tile-aligned.
    x_pad = jnp.pad(x.astype(jnp.float32), ((0, n_cols - N), (0, 0)))
    w_pad = jnp.pad(W.astype(jnp.float32), ((0, c_pad - c_out), (0, 0)))
    xw_p = jnp.dot(x_pad, w_pad.T,
                   preferred_element_type=jnp.float32).astype(jnp.bfloat16)
    b_p = jnp.pad(bias.astype(jnp.float32), (0, c_pad - c_out)).reshape(1, c_pad)

    flops = 2 * n_rows * n_cols * c_pad
    bytes_accessed = (adj_p.size * 2                 # bf16 adjacency (read once)
                      + xw_p.size * 2 * grid[0]      # xw tiles re-read per row tile
                      + n_rows * c_pad * x.dtype.itemsize   # output
                      + c_pad * 4)                   # bias

    out_p = pl.pallas_call(
        gcn_kernel,
        out_shape=jax.ShapeDtypeStruct((n_rows, c_pad), x.dtype),
        grid_spec=pltpu.PrefetchScalarGridSpec(
            num_scalar_prefetch=0,
            grid=grid,
            in_specs=[
                pl.BlockSpec((tm, tk), lambda i, k: (i, k)),     # adj tile
                pl.BlockSpec((tk, c_pad), lambda i, k: (k, 0)),  # xw tile
                pl.BlockSpec((1, c_pad), lambda i, k: (0, 0)),   # bias (resident)
            ],
            out_specs=pl.BlockSpec((tm, c_pad), lambda i, k: (i, 0)),
            scratch_shapes=[pltpu.VMEM((tm, c_pad), jnp.float32)],
        ),
        compiler_params=pltpu.CompilerParams(
            dimension_semantics=("parallel", "arbitrary"),
        ),
        cost_estimate=pl.CostEstimate(
            flops=flops, transcendentals=0, bytes_accessed=bytes_accessed),
    )(adj_p, xw_p, b_p)

    return out_p[:N, :c_out]


def reference_forward(x, edge_index, x0, W, bias):
    """Original (f32, non-reassociated) semantics: (adj @ x) @ W^T + b."""
    del x0
    N = x.shape[0]
    adj = _normalized_dense_adj(edge_index, N)
    return (adj @ x) @ W.T + bias


def reference_forward_bf16(x, edge_index, x0, W, bias):
    """Same math as the kernel: bf16-quantized adj/xw, f32 accumulation."""
    del x0
    N = x.shape[0]
    adj = _normalized_dense_adj(edge_index, N).astype(jnp.bfloat16).astype(jnp.float32)
    xw = (x @ W.T).astype(jnp.bfloat16).astype(jnp.float32)
    return adj @ xw + bias


if __name__ == "__main__":
    key = jax.random.PRNGKey(0)
    k_x, k_e, k_w, k_b = jax.random.split(key, 4)

    N = 16            # number of nodes
    E = 40            # number of edges
    in_channels = 8
    out_channels = 32

    x = jax.random.normal(k_x, (N, in_channels), dtype=jnp.float32)
    x0 = x  # initial-residual features (unused with use_init=False)
    edge_index = jax.random.randint(k_e, (2, E), 0, N, dtype=jnp.int32)

    # nn.Linear(in_channels, out_channels) default init: U(-k, k), k = 1/sqrt(fan_in)
    bound = 1.0 / jnp.sqrt(jnp.float32(in_channels))
    W = jax.random.uniform(k_w, (out_channels, in_channels), jnp.float32, -bound, bound)
    bias = jax.random.uniform(k_b, (out_channels,), jnp.float32, -bound, bound)

    out = graph_conv_forward(x, edge_index, x0, W, bias)
    out = jax.block_until_ready(out)
    assert out.shape == (N, out_channels)

    # Tight check against a reference doing exactly the kernel's (bf16 in, f32 acc) math.
    ref_q = reference_forward_bf16(x, edge_index, x0, W, bias)
    assert jnp.allclose(out, ref_q, atol=2e-3, rtol=2e-3), "mismatch vs bf16 reference"

    # Loose check against the original full-f32 module semantics.
    ref = reference_forward(x, edge_index, x0, W, bias)
    assert jnp.allclose(out, ref, atol=5e-2, rtol=5e-2), "mismatch vs f32 reference"

    print("KERNEL_OK")
</pallas_src>

<mosaic_0001>
module attributes {stable_mosaic.version = 11 : i64} {
  func.func @gcn_kernel(%arg0: i32, %arg1: i32, %arg2: memref<16x128xbf16, #tpu.memory_space<vmem>>, %arg3: memref<128x128xbf16, #tpu.memory_space<vmem>>, %arg4: memref<1x128xf32, #tpu.memory_space<vmem>>, %arg5: memref<16x128xf32, #tpu.memory_space<vmem>>, %arg6: memref<16x128xf32, #tpu.memory_space<vmem>>) attributes {dimension_semantics = [#tpu.dimension_semantics<parallel>, #tpu.dimension_semantics<arbitrary>], iteration_bounds = array<i64: 1, 1>, scalar_prefetch = 0 : i64, scratch_operands = 1 : i64, tpu.core_type = #tpu.core_type<tc>, window_params = [{transform_indices = @transform_0, window_bounds = array<i64: 16, 128>}, {transform_indices = @transform_1, window_bounds = array<i64: 128, 128>}, {pipeline_mode = #tpu.pipeline_mode<synchronous>, transform_indices = @transform_2, window_bounds = array<i64: 1, 128>}, {transform_indices = @transform_3, window_bounds = array<i64: 16, 128>}]} {
    %c0_i32 = arith.constant 0 : i32
    %0 = arith.cmpi eq, %arg1, %c0_i32 : i32
    %1 = arith.extui %0 : i1 to i32
    %c0_i32_0 = arith.constant 0 : i32
    %2 = arith.cmpi ne, %1, %c0_i32_0 : i32
    scf.if %2 {
      %cst_10 = arith.constant 0.000000e+00 : f32
      %12 = vector.broadcast %cst_10 : f32 to vector<16x128xf32>
      %c0_11 = arith.constant 0 : index
      %c0_12 = arith.constant 0 : index
      %13 = vector.load %arg6[%c0_11, %c0_12] : memref<16x128xf32, #tpu.memory_space<vmem>>, vector<16x128xf32>
      tpu.vector_store %arg6[%c0_11, %c0_12], %12 {strides = array<i32>} : memref<16x128xf32, #tpu.memory_space<vmem>>, vector<16x128xf32>,
    } else {
    }
    %c0 = arith.constant 0 : index
    %c0_1 = arith.constant 0 : index
    %3 = vector.load %arg6[%c0, %c0_1] : memref<16x128xf32, #tpu.memory_space<vmem>>, vector<16x128xf32>
    %c0_2 = arith.constant 0 : index
    %c0_3 = arith.constant 0 : index
    %4 = vector.load %arg2[%c0_2, %c0_3] : memref<16x128xbf16, #tpu.memory_space<vmem>>, vector<16x128xbf16>
    %c0_4 = arith.constant 0 : index
    %c0_5 = arith.constant 0 : index
    %5 = vector.load %arg3[%c0_4, %c0_5] : memref<128x128xbf16, #tpu.memory_space<vmem>>, vector<128x128xbf16>
    %cst = arith.constant dense<0.000000e+00> : vector<16x128xf32>
    %6 = tpu.matmul %4, %5, %cst {dimension_numbers = #tpu.dot_dimension_numbers<[1], [0], [0], [1], [0, 0, 1, 1], [], []>} : vector<16x128xbf16>, vector<128x128xbf16>, vector<16x128xf32> -> vector<16x128xf32>
    %7 = arith.addf %3, %6 : vector<16x128xf32>
    %c0_6 = arith.constant 0 : index
    %c0_7 = arith.constant 0 : index
    %8 = vector.load %arg6[%c0_6, %c0_7] : memref<16x128xf32, #tpu.memory_space<vmem>>, vector<16x128xf32>
    tpu.vector_store %arg6[%c0_6, %c0_7], %7 {strides = array<i32>} : memref<16x128xf32, #tpu.memory_space<vmem>>, vector<16x128xf32>,
    %c0_i32_8 = arith.constant 0 : i32
    %9 = arith.cmpi eq, %arg1, %c0_i32_8 : i32
    %10 = arith.extui %9 : i1 to i32
    %c0_i32_9 = arith.constant 0 : i32
    %11 = arith.cmpi ne, %10, %c0_i32_9 : i32
    scf.if %11 {
      %c0_10 = arith.constant 0 : index
      %c0_11 = arith.constant 0 : index
      %12 = vector.load %arg6[%c0_10, %c0_11] : memref<16x128xf32, #tpu.memory_space<vmem>>, vector<16x128xf32>
      %c0_12 = arith.constant 0 : index
      %c0_13 = arith.constant 0 : index
      %13 = vector.load %arg4[%c0_12, %c0_13] : memref<1x128xf32, #tpu.memory_space<vmem>>, vector<1x128xf32>
      %14 = vector.broadcast %13 : vector<1x128xf32> to vector<16x128xf32>
      %15 = arith.addf %12, %14 : vector<16x128xf32>
      %c0_14 = arith.constant 0 : index
      %c0_15 = arith.constant 0 : index
      %16 = vector.load %arg5[%c0_14, %c0_15] : memref<16x128xf32, #tpu.memory_space<vmem>>, vector<16x128xf32>
      tpu.vector_store %arg5[%c0_14, %c0_15], %15 {strides = array<i32>} : memref<16x128xf32, #tpu.memory_space<vmem>>, vector<16x128xf32>,
    } else {
    }
    return
  }
  func.func @transform_0(%arg0: i32, %arg1: i32) -> (i32, i32) {
    %c0_i32 = arith.constant 0 : i32
    return %arg0, %arg1 : i32, i32
  }
  func.func @transform_1(%arg0: i32, %arg1: i32) -> (i32, i32) {
    %c0_i32 = arith.constant 0 : i32
    %c0_i32_0 = arith.constant 0 : i32
    return %arg1, %c0_i32 : i32, i32
  }
  func.func @transform_2(%arg0: i32, %arg1: i32) -> (i32, i32) {
    %c0_i32 = arith.constant 0 : i32
    %c0_i32_0 = arith.constant 0 : i32
    %c0_i32_1 = arith.constant 0 : i32
    return %c0_i32, %c0_i32_0 : i32, i32
  }
  func.func @transform_3(%arg0: i32, %arg1: i32) -> (i32, i32) {
    %c0_i32 = arith.constant 0 : i32
    %c0_i32_0 = arith.constant 0 : i32
    return %arg0, %c0_i32 : i32, i32
  }
}

</mosaic_0001>

<bundles_post_ra>
// kernel: graph_conv_forward.1
= control target key start
LH: loop header
LB: loop body
LE: loop exit
PB: predicated region body
PF: predicated region fallthrough
CT: control target
= control target key end

     0   :  { %v250_v1 = vmov 0.0   ;;  %vm251_vm0 = vmmov 0   ;;  %s317_s0 = inlined_call_operand.vmem [shape: bf16[16,128], index: 0, kind: input, shape index: {}]   ;;  %s318_s1 = inlined_call_operand.vmem [shape: bf16[128,128], index: 1, kind: input, shape index: {}]   ;;  %s319_s2 = inlined_call_operand.vmem [shape: f32[1,128], index: 2, kind: input, shape index: {}]   ;;  %s320_s3 = inlined_call_operand.hbm [shape: f32[16,128], index: 3, kind: output, shape index: {}]  }
   0x1   :  { %v217_v0 = vld [vmem:[%s318_s1] sm:$0xff]   ;;  %192 = vmatprep.subr.bf16.mxu0 %v250_v1  ;;  %v218_v2 = vld [vmem:[%s318_s1 + $0x8] sm:$0xff]   ;;  %208 = vmatprep.mubr.msk.bf16.mxu0 %vm251_vm0, %v250_v1  ;;  %v219_v3 = vld [vmem:[%s318_s1 + $0x10] sm:$0xff]  }
   0x2   :  { %193 = vmatpush3.bf16.msra.mxu0 %v217_v0 }
   0x3   :  { %194 = vmatprep.subr.bf16.mxu0 %v250_v1 }
   0x6   :  { %195 = vmatpush3.bf16.msra.mxu0 %v218_v2 }
   0x7   :  { %196 = vmatprep.subr.bf16.mxu0 %v250_v1 }
   0x8   :  { %8 = vsyncpa [#allocation4], 0  ;;  %v220_v4 = vld [vmem:[%s318_s1 + $0x18] sm:$0xff]   ;;  %v221_v5 = vld [vmem:[%s318_s1 + $0x20] sm:$0xff]   ;;  %s252_s5 = smov [#allocation3]  }
   0x9   :  { %v222_v6 = vld [vmem:[%s318_s1 + $0x28] sm:$0xff]   ;;  %v223_v7 = vld [vmem:[%s318_s1 + $0x30] sm:$0xff]   ;;  %v224_v8 = vld [vmem:[%s318_s1 + $0x38] sm:$0xff]   ;;  %s162_s6 = sshll.u32 %s252_s5, 4  ;;  %s163_s6 = int_to_ptr.vmem [resolvable:$true] %s162_s6 }
   0xa   :  { %197 = vmatpush3.bf16.msra.mxu0 %v219_v3  ;;  %v225_v9 = vld [vmem:[%s317_s0] sm:$0xff]   ;;  %s226_s1 = scalar_lea.vmem %s163_s6, 256  ;;  %p231_p1 = scmp.lt.s32.totalorder %s163_s6, %s163_s6 }
   0xb   :  { %198 = vmatprep.subr.bf16.mxu0 %v250_v1  ;;  %v182_v10 = vld [vmem:[%s319_s2] ss:$0 sm:$0xff]  ;;  %p227_p0 = scmp.ne.s32.totalorder %s163_s6, %s226_s1  ;;  %p232_p2 = scmp.lt.s32.totalorder %s226_s1, %s226_s1 }
   0xd   :  { %p233_p3 = por %p232_p2, %p231_p1 }
   0xe   :  { %199 = vmatpush3.bf16.msra.mxu0 %v220_v4 }
   0xf   :  { %200 = vmatprep.subr.bf16.mxu0 %v250_v1  ;;  %p234_p4 = pnand %p233_p3, %p227_p0 }
  0x12   :  { %201 = vmatpush3.bf16.msra.mxu0 %v221_v5 }
  0x13   :  { %202 = vmatprep.subr.bf16.mxu0 %v250_v1 }
  0x16   :  { %203 = vmatpush3.bf16.msra.mxu0 %v222_v6 }
  0x17   :  { %204 = vmatprep.subr.bf16.mxu0 %v250_v1 }
  0x1a   :  { %205 = vmatpush3.bf16.msra.mxu0 %v223_v7 }
  0x1b   :  { %206 = vmatprep.subr.bf16.mxu0 %v250_v1 }
  0x1e   :  { %207 = vmatpush3.bf16.msra.mxu0 %v224_v8 }
  0x21   :  { %209 = vmatmul.mubr.bf16.vlgmr.msra.gmra.mrb[0].mxu0 %v225_v9 }
  0xf4   :  { %v130_v11 = vpop.f32.mrb[0].mxu0 }
  0xf5   :  { %v153_v12 = vadd.f32 %v182_v10, %v130_v11  ;;  %v210_v13 = vpop.f32.mrb[1].mxu0 }
  0xf6   :  { %v133_v14 = vpop.f32.mrb[2].mxu0 }
  0xf7   :  { %155 = vst [vmem:[#allocation3] sm:$0xff] %v153_v12  ;;  %v154_v15 = vadd.f32 %v182_v10, %v133_v14  ;;  %v211_v16 = vpop.f32.mrb[3].mxu0 }
  0xf9   :  { %156 = vst [vmem:[#allocation3 + $0x8] sm:$0xff] %v154_v15 }
  0xfa   :  { %237 = shalt.err (!%p234_p4)
}
  0xfb   :  { %s238_s7 = scalar_lea.hbm %s320_s3, 256 }
  0xfc   :  { %p239_p5 = scmp.ne.s32.totalorder %s320_s3, %s238_s7  ;;  %p242_p6 = scmp.lt.u32.totalorder %s238_s7, %s320_s3 }
  0xfe   :  { %p244_p7 = pnand %p242_p6, %p239_p5 }
 0x100   :  { %247 = shalt.err (!%p244_p7)
}
 0x101   :  { %s253_s12 = smov 128   ;;  %s254_s13 = smov 8  }
 0x102   :  { %168 = dma.vmem_to_hbm [thread:$0]  %s163_s6, 256, %s320_s3, [#allocation4], %s253_s12, %s253_s12, %s254_s13  }
 0x103   :  { %248 = dma.done.wait [#allocation4], 256  }
 0x104   :  { %249 = vsyncadd [#allocation4], 4294967040 }
 0x105   :  { %172 = vsyncpa [#allocation4], 1 }

</bundles_post_ra>
